<compile_context>
chip_gen: v7x
topology: tpu7x:2x2x1
jax: 0.10.0
libtpu: 0.0.40
codegen_flags: <defaults>
</compile_context>

<pallas_src>
import jax
import jax.numpy as jnp
import numpy as np
from jax.experimental import pallas as pl
from jax.experimental.pallas import tpu as pltpu


def resblock_kernel(x_ref, m1_ref, b1_ref, t1s_ref, m2_ref, b2_ref, s2_ref,
                    t2_ref, out_ref, xpad):
    # x_ref   : (1, H, W*C) f32   channel-flattened input rows (also the residual)
    # m1_ref  : (3, W*C, W*C) bf16 conv_in row-matrices (one per kh tap)
    # m2_ref  : (3, W*C, W*C) bf16 conv_out row-matrices (BN1 scale pre-folded)
    # b1/b2   : (1, W*C) f32 conv biases tiled across W
    # t1s_ref : (1, W*C) f32 BN1 shift / BN1 scale, tiled across W
    # s2/t2   : (1, W*C) f32 BN2 scale / shift, tiled across W
    # out_ref : (1, H, W*C) f32
    # xpad    : VMEM (H+2, W*C) f32 scratch: padded conv input, reused for both
    #           convs; rows 0 and H+1 are the zero halo for SAME padding along H.
    H = out_ref.shape[1]
    WC = out_ref.shape[2]

    # Re-zero only the two halo rows each step (interior is fully overwritten
    # below).  Doing it per step keeps the kernel correct when the batch axis is
    # sharded across TensorCores (each core has its own scratch).
    zero_row = jnp.zeros((1, WC), jnp.float32)
    xpad[0:1, :] = zero_row
    xpad[H + 1:H + 2, :] = zero_row

    x = x_ref[0]                      # (H, W*C) f32 — conv_in input and residual
    xpad[1:H + 1, :] = x

    # ---- conv_in: 3 lane-dense bf16 MXU dots, f32 accumulation ----
    acc = jnp.zeros((H, WC), jnp.float32)
    for dh in range(3):
        acc += jnp.dot(xpad[dh:dh + H, :].astype(jnp.bfloat16), m1_ref[dh],
                       preferred_element_type=jnp.float32)
    y = jnp.maximum(acc + b1_ref[...], 0.0)      # ReLU(conv + bias)
    y = y + t1s_ref[...]                         # BN1 (scale folded into m2)
    # Dropout(p=0.25): identity in eval mode.

    # ---- conv_out: reuse the same padded scratch (halo rows still zero) ----
    xpad[1:H + 1, :] = y
    acc = jnp.zeros((H, WC), jnp.float32)
    for dh in range(3):
        acc += jnp.dot(xpad[dh:dh + H, :].astype(jnp.bfloat16), m2_ref[dh],
                       preferred_element_type=jnp.float32)
    z = jnp.maximum(acc + b2_ref[...], 0.0)      # ReLU(conv + bias)
    z = z * s2_ref[...] + t2_ref[...]            # BN2 (eval, folded)
    out_ref[0] = (z + x).astype(out_ref.dtype)   # residual add


def resblock_forward(x_nhwc, params, eps=1e-5):
    """x_nhwc: (N, H, W, C) float32. Returns (N, H, W, C)."""
    N, H, W, C = x_nhwc.shape
    WC = W * C

    # Fold BatchNorm (eval mode) into per-channel scale/shift (glue, plain JAX).
    def fold_bn(gamma, beta, mean, var):
        s = gamma / jnp.sqrt(var + eps)
        t = beta - mean * s
        return s, t

    s1, t1 = fold_bn(params["gamma1"], params["beta1"],
                     params["mean1"], params["var1"])
    s2, t2 = fold_bn(params["gamma2"], params["beta2"],
                     params["mean2"], params["var2"])

    # Block-tridiagonal conv "row matrices": for kernel-row tap dh,
    #   M[dh][(w+dw-1)*C + ci, w*C + co] = w[dh, dw, ci, co]
    # so an entire flattened image row (W*C,) is convolved (kw taps + channel mix
    # + SAME zero padding along W) by a single dense (W*C, W*C) matmul.  Intended
    # for small-channel ResBlocks where W*C is O(128); for large C a channels-last
    # K=9C im2col formulation (with spatial row tiling) is preferable.
    def conv_row_matrices(w):  # (3, 3, C, C) -> (3, W*C, W*C)
        mats = []
        for dh in range(3):
            m = jnp.zeros((WC, WC), jnp.float32)
            for dw in range(3):
                m = m + jnp.kron(jnp.eye(W, k=1 - dw, dtype=jnp.float32),
                                 w[dh, dw])
            mats.append(m)
        return jnp.stack(mats)

    # Fold BN1's per-channel scale into conv_out's input channels (safe under the
    # zero padding); the BN1 shift is applied in-kernel as t1/s1.
    # (Assumes gamma1 != 0, which holds for standard eval-mode BatchNorm.)
    w2_scaled = params["w2"] * s1[None, None, :, None]
    m1 = conv_row_matrices(params["w1"]).astype(jnp.bfloat16)
    m2 = conv_row_matrices(w2_scaled).astype(jnp.bfloat16)

    def rowvec(v):  # per-channel (C,) -> per-lane (1, W*C)
        return jnp.tile(v, W).reshape(1, WC).astype(jnp.float32)

    b1r, b2r = rowvec(params["b1"]), rowvec(params["b2"])
    t1sr = rowvec(t1 / s1)
    s2r, t2r = rowvec(s2), rowvec(t2)

    x_rows = x_nhwc.reshape(N, H, WC)   # free reshape -> lane-dense rows

    img_spec = pl.BlockSpec((1, H, WC), lambda n: (n, 0, 0))
    mat_spec = pl.BlockSpec((3, WC, WC), lambda n: (0, 0, 0))
    vec_spec = pl.BlockSpec((1, WC), lambda n: (0, 0))

    out = pl.pallas_call(
        resblock_kernel,
        out_shape=jax.ShapeDtypeStruct((N, H, WC), x_nhwc.dtype),
        grid_spec=pltpu.PrefetchScalarGridSpec(
            num_scalar_prefetch=0,
            grid=(N,),
            in_specs=[img_spec, mat_spec, vec_spec, vec_spec,
                      mat_spec, vec_spec, vec_spec, vec_spec],
            out_specs=img_spec,
            scratch_shapes=[pltpu.VMEM((H + 2, WC), jnp.float32)],
        ),
        compiler_params=pltpu.CompilerParams(
            dimension_semantics=("parallel",),
            vmem_limit_bytes=32 * 1024 * 1024),
    )(x_rows, m1, b1r, t1sr, m2, b2r, s2r, t2r)
    return out.reshape(N, H, W, C)


def resblock_ref(x_nhwc, params, eps=1e-5):
    """Pure-JAX reference (same eval semantics) for validation."""
    def conv(x, w, b):
        y = jax.lax.conv_general_dilated(
            x, w, window_strides=(1, 1), padding="SAME",
            dimension_numbers=("NHWC", "HWIO", "NHWC"),
            precision=jax.lax.Precision.HIGHEST)
        return y + b

    def bn(x, gamma, beta, mean, var):
        return (x - mean) / jnp.sqrt(var + eps) * gamma + beta

    y = jax.nn.relu(conv(x_nhwc, params["w1"], params["b1"]))
    y = bn(y, params["gamma1"], params["beta1"], params["mean1"], params["var1"])
    y = jax.nn.relu(conv(y, params["w2"], params["b2"]))
    y = bn(y, params["gamma2"], params["beta2"], params["mean2"], params["var2"])
    return y + x_nhwc


if __name__ == "__main__":
    N, H, W, C = 2, 16, 16, 8
    key = jax.random.PRNGKey(0)
    ks = jax.random.split(key, 13)

    x = jax.random.normal(ks[0], (N, H, W, C), jnp.float32)

    params = {
        "w1":     jax.random.normal(ks[1], (3, 3, C, C), jnp.float32) * 0.1,
        "b1":     jax.random.normal(ks[2], (C,), jnp.float32) * 0.1,
        "gamma1": 1.0 + 0.1 * jax.random.normal(ks[3], (C,), jnp.float32),
        "beta1":  0.1 * jax.random.normal(ks[4], (C,), jnp.float32),
        "mean1":  0.1 * jax.random.normal(ks[5], (C,), jnp.float32),
        "var1":   jax.random.uniform(ks[6], (C,), jnp.float32, 0.5, 1.5),
        "w2":     jax.random.normal(ks[7], (3, 3, C, C), jnp.float32) * 0.1,
        "b2":     jax.random.normal(ks[8], (C,), jnp.float32) * 0.1,
        "gamma2": 1.0 + 0.1 * jax.random.normal(ks[9], (C,), jnp.float32),
        "beta2":  0.1 * jax.random.normal(ks[10], (C,), jnp.float32),
        "mean2":  0.1 * jax.random.normal(ks[11], (C,), jnp.float32),
        "var2":   jax.random.uniform(ks[12], (C,), jnp.float32, 0.5, 1.5),
    }

    out = resblock_forward(x, params)
    jax.block_until_ready(out)

    ref = resblock_ref(x, params)
    np.testing.assert_allclose(np.asarray(out), np.asarray(ref),
                               rtol=2e-2, atol=2e-2)
    print("KERNEL_OK")
</pallas_src>

<mosaic_0001>
module attributes {stable_mosaic.version = 11 : i64} {
  func.func @resblock_kernel(%arg0: i32, %arg1: memref<1x16x128xf32, #tpu.memory_space<vmem>>, %arg2: memref<3x128x128xbf16, #tpu.memory_space<vmem>>, %arg3: memref<1x128xf32, #tpu.memory_space<vmem>>, %arg4: memref<1x128xf32, #tpu.memory_space<vmem>>, %arg5: memref<3x128x128xbf16, #tpu.memory_space<vmem>>, %arg6: memref<1x128xf32, #tpu.memory_space<vmem>>, %arg7: memref<1x128xf32, #tpu.memory_space<vmem>>, %arg8: memref<1x128xf32, #tpu.memory_space<vmem>>, %arg9: memref<1x16x128xf32, #tpu.memory_space<vmem>>, %arg10: memref<18x128xf32, #tpu.memory_space<vmem>>) attributes {dimension_semantics = [#tpu.dimension_semantics<parallel>], iteration_bounds = array<i64: 2>, scalar_prefetch = 0 : i64, scratch_operands = 1 : i64, tpu.core_type = #tpu.core_type<tc>, window_params = [{transform_indices = @transform_0, window_bounds = array<i64: 1, 16, 128>}, {pipeline_mode = #tpu.pipeline_mode<synchronous>, transform_indices = @transform_1, window_bounds = array<i64: 3, 128, 128>}, {pipeline_mode = #tpu.pipeline_mode<synchronous>, transform_indices = @transform_2, window_bounds = array<i64: 1, 128>}, {pipeline_mode = #tpu.pipeline_mode<synchronous>, transform_indices = @transform_3, window_bounds = array<i64: 1, 128>}, {pipeline_mode = #tpu.pipeline_mode<synchronous>, transform_indices = @transform_4, window_bounds = array<i64: 3, 128, 128>}, {pipeline_mode = #tpu.pipeline_mode<synchronous>, transform_indices = @transform_5, window_bounds = array<i64: 1, 128>}, {pipeline_mode = #tpu.pipeline_mode<synchronous>, transform_indices = @transform_6, window_bounds = array<i64: 1, 128>}, {pipeline_mode = #tpu.pipeline_mode<synchronous>, transform_indices = @transform_7, window_bounds = array<i64: 1, 128>}, {transform_indices = @transform_8, window_bounds = array<i64: 1, 16, 128>}]} {
    %cst = arith.constant 0.000000e+00 : f32
    %0 = vector.broadcast %cst : f32 to vector<1x128xf32>
    %c0 = arith.constant 0 : index
    %c0_0 = arith.constant 0 : index
    %1 = vector.load %arg10[%c0, %c0_0] : memref<18x128xf32, #tpu.memory_space<vmem>>, vector<1x128xf32>
    tpu.vector_store %arg10[%c0, %c0_0], %0 {strides = array<i32>} : memref<18x128xf32, #tpu.memory_space<vmem>>, vector<1x128xf32>,
    %c17 = arith.constant 17 : index
    %c0_1 = arith.constant 0 : index
    %2 = vector.load %arg10[%c17, %c0_1] : memref<18x128xf32, #tpu.memory_space<vmem>>, vector<1x128xf32>
    tpu.vector_store %arg10[%c17, %c0_1], %0 {strides = array<i32>} : memref<18x128xf32, #tpu.memory_space<vmem>>, vector<1x128xf32>,
    %c0_2 = arith.constant 0 : index
    %c0_3 = arith.constant 0 : index
    %c0_4 = arith.constant 0 : index
    %3 = vector.load %arg1[%c0_2, %c0_3, %c0_4] : memref<1x16x128xf32, #tpu.memory_space<vmem>>, vector<1x16x128xf32>
    %4 = vector.shape_cast %3 : vector<1x16x128xf32> to vector<16x128xf32>
    %c1 = arith.constant 1 : index
    %c0_5 = arith.constant 0 : index
    %5 = vector.load %arg10[%c1, %c0_5] : memref<18x128xf32, #tpu.memory_space<vmem>>, vector<16x128xf32>
    tpu.vector_store %arg10[%c1, %c0_5], %4 {strides = array<i32>} : memref<18x128xf32, #tpu.memory_space<vmem>>, vector<16x128xf32>,
    %cst_6 = arith.constant 0.000000e+00 : f32
    %6 = vector.broadcast %cst_6 : f32 to vector<16x128xf32>
    %c0_7 = arith.constant 0 : index
    %c0_8 = arith.constant 0 : index
    %7 = vector.load %arg10[%c0_7, %c0_8] : memref<18x128xf32, #tpu.memory_space<vmem>>, vector<16x128xf32>
    %8 = arith.truncf %7 : vector<16x128xf32> to vector<16x128xbf16>
    %c0_9 = arith.constant 0 : index
    %c0_10 = arith.constant 0 : index
    %c0_11 = arith.constant 0 : index
    %9 = vector.load %arg2[%c0_9, %c0_10, %c0_11] : memref<3x128x128xbf16, #tpu.memory_space<vmem>>, vector<1x128x128xbf16>
    %10 = vector.shape_cast %9 : vector<1x128x128xbf16> to vector<128x128xbf16>
    %cst_12 = arith.constant dense<0.000000e+00> : vector<16x128xf32>
    %11 = tpu.matmul %8, %10, %cst_12 {dimension_numbers = #tpu.dot_dimension_numbers<[1], [0], [0], [1], [0, 0, 1, 1], [], []>} : vector<16x128xbf16>, vector<128x128xbf16>, vector<16x128xf32> -> vector<16x128xf32>
    %12 = arith.addf %6, %11 : vector<16x128xf32>
    %c1_13 = arith.constant 1 : index
    %c0_14 = arith.constant 0 : index
    %13 = vector.load %arg10[%c1_13, %c0_14] : memref<18x128xf32, #tpu.memory_space<vmem>>, vector<16x128xf32>
    %14 = arith.truncf %13 : vector<16x128xf32> to vector<16x128xbf16>
    %c1_15 = arith.constant 1 : index
    %c0_16 = arith.constant 0 : index
    %c0_17 = arith.constant 0 : index
    %15 = vector.load %arg2[%c1_15, %c0_16, %c0_17] : memref<3x128x128xbf16, #tpu.memory_space<vmem>>, vector<1x128x128xbf16>
    %16 = vector.shape_cast %15 : vector<1x128x128xbf16> to vector<128x128xbf16>
    %cst_18 = arith.constant dense<0.000000e+00> : vector<16x128xf32>
    %17 = tpu.matmul %14, %16, %cst_18 {dimension_numbers = #tpu.dot_dimension_numbers<[1], [0], [0], [1], [0, 0, 1, 1], [], []>} : vector<16x128xbf16>, vector<128x128xbf16>, vector<16x128xf32> -> vector<16x128xf32>
    %18 = arith.addf %12, %17 : vector<16x128xf32>
    %c2 = arith.constant 2 : index
    %c0_19 = arith.constant 0 : index
    %19 = vector.load %arg10[%c2, %c0_19] : memref<18x128xf32, #tpu.memory_space<vmem>>, vector<16x128xf32>
    %20 = arith.truncf %19 : vector<16x128xf32> to vector<16x128xbf16>
    %c2_20 = arith.constant 2 : index
    %c0_21 = arith.constant 0 : index
    %c0_22 = arith.constant 0 : index
    %21 = vector.load %arg2[%c2_20, %c0_21, %c0_22] : memref<3x128x128xbf16, #tpu.memory_space<vmem>>, vector<1x128x128xbf16>
    %22 = vector.shape_cast %21 : vector<1x128x128xbf16> to vector<128x128xbf16>
    %cst_23 = arith.constant dense<0.000000e+00> : vector<16x128xf32>
    %23 = tpu.matmul %20, %22, %cst_23 {dimension_numbers = #tpu.dot_dimension_numbers<[1], [0], [0], [1], [0, 0, 1, 1], [], []>} : vector<16x128xbf16>, vector<128x128xbf16>, vector<16x128xf32> -> vector<16x128xf32>
    %24 = arith.addf %18, %23 : vector<16x128xf32>
    %c0_24 = arith.constant 0 : index
    %c0_25 = arith.constant 0 : index
    %25 = vector.load %arg3[%c0_24, %c0_25] : memref<1x128xf32, #tpu.memory_space<vmem>>, vector<1x128xf32>
    %26 = vector.broadcast %25 : vector<1x128xf32> to vector<16x128xf32>
    %27 = arith.addf %24, %26 : vector<16x128xf32>
    %cst_26 = arith.constant 0.000000e+00 : f32
    %28 = vector.broadcast %cst_26 : f32 to vector<16x128xf32>
    %29 = arith.maximumf %27, %28 : vector<16x128xf32>
    %c0_27 = arith.constant 0 : index
    %c0_28 = arith.constant 0 : index
    %30 = vector.load %arg4[%c0_27, %c0_28] : memref<1x128xf32, #tpu.memory_space<vmem>>, vector<1x128xf32>
    %31 = vector.broadcast %30 : vector<1x128xf32> to vector<16x128xf32>
    %32 = arith.addf %29, %31 : vector<16x128xf32>
    %c1_29 = arith.constant 1 : index
    %c0_30 = arith.constant 0 : index
    %33 = vector.load %arg10[%c1_29, %c0_30] : memref<18x128xf32, #tpu.memory_space<vmem>>, vector<16x128xf32>
    tpu.vector_store %arg10[%c1_29, %c0_30], %32 {strides = array<i32>} : memref<18x128xf32, #tpu.memory_space<vmem>>, vector<16x128xf32>,
    %cst_31 = arith.constant 0.000000e+00 : f32
    %34 = vector.broadcast %cst_31 : f32 to vector<16x128xf32>
    %c0_32 = arith.constant 0 : index
    %c0_33 = arith.constant 0 : index
    %35 = vector.load %arg10[%c0_32, %c0_33] : memref<18x128xf32, #tpu.memory_space<vmem>>, vector<16x128xf32>
    %36 = arith.truncf %35 : vector<16x128xf32> to vector<16x128xbf16>
    %c0_34 = arith.constant 0 : index
    %c0_35 = arith.constant 0 : index
    %c0_36 = arith.constant 0 : index
    %37 = vector.load %arg5[%c0_34, %c0_35, %c0_36] : memref<3x128x128xbf16, #tpu.memory_space<vmem>>, vector<1x128x128xbf16>
    %38 = vector.shape_cast %37 : vector<1x128x128xbf16> to vector<128x128xbf16>
    %cst_37 = arith.constant dense<0.000000e+00> : vector<16x128xf32>
    %39 = tpu.matmul %36, %38, %cst_37 {dimension_numbers = #tpu.dot_dimension_numbers<[1], [0], [0], [1], [0, 0, 1, 1], [], []>} : vector<16x128xbf16>, vector<128x128xbf16>, vector<16x128xf32> -> vector<16x128xf32>
    %40 = arith.addf %34, %39 : vector<16x128xf32>
    %c1_38 = arith.constant 1 : index
    %c0_39 = arith.constant 0 : index
    %41 = vector.load %arg10[%c1_38, %c0_39] : memref<18x128xf32, #tpu.memory_space<vmem>>, vector<16x128xf32>
    %42 = arith.truncf %41 : vector<16x128xf32> to vector<16x128xbf16>
    %c1_40 = arith.constant 1 : index
    %c0_41 = arith.constant 0 : index
    %c0_42 = arith.constant 0 : index
    %43 = vector.load %arg5[%c1_40, %c0_41, %c0_42] : memref<3x128x128xbf16, #tpu.memory_space<vmem>>, vector<1x128x128xbf16>
    %44 = vector.shape_cast %43 : vector<1x128x128xbf16> to vector<128x128xbf16>
    %cst_43 = arith.constant dense<0.000000e+00> : vector<16x128xf32>
    %45 = tpu.matmul %42, %44, %cst_43 {dimension_numbers = #tpu.dot_dimension_numbers<[1], [0], [0], [1], [0, 0, 1, 1], [], []>} : vector<16x128xbf16>, vector<128x128xbf16>, vector<16x128xf32> -> vector<16x128xf32>
    %46 = arith.addf %40, %45 : vector<16x128xf32>
    %c2_44 = arith.constant 2 : index
    %c0_45 = arith.constant 0 : index
    %47 = vector.load %arg10[%c2_44, %c0_45] : memref<18x128xf32, #tpu.memory_space<vmem>>, vector<16x128xf32>
    %48 = arith.truncf %47 : vector<16x128xf32> to vector<16x128xbf16>
    %c2_46 = arith.constant 2 : index
    %c0_47 = arith.constant 0 : index
    %c0_48 = arith.constant 0 : index
    %49 = vector.load %arg5[%c2_46, %c0_47, %c0_48] : memref<3x128x128xbf16, #tpu.memory_space<vmem>>, vector<1x128x128xbf16>
    %50 = vector.shape_cast %49 : vector<1x128x128xbf16> to vector<128x128xbf16>
    %cst_49 = arith.constant dense<0.000000e+00> : vector<16x128xf32>
    %51 = tpu.matmul %48, %50, %cst_49 {dimension_numbers = #tpu.dot_dimension_numbers<[1], [0], [0], [1], [0, 0, 1, 1], [], []>} : vector<16x128xbf16>, vector<128x128xbf16>, vector<16x128xf32> -> vector<16x128xf32>
    %52 = arith.addf %46, %51 : vector<16x128xf32>
    %c0_50 = arith.constant 0 : index
    %c0_51 = arith.constant 0 : index
    %53 = vector.load %arg6[%c0_50, %c0_51] : memref<1x128xf32, #tpu.memory_space<vmem>>, vector<1x128xf32>
    %54 = vector.broadcast %53 : vector<1x128xf32> to vector<16x128xf32>
    %55 = arith.addf %52, %54 : vector<16x128xf32>
    %cst_52 = arith.constant 0.000000e+00 : f32
    %56 = vector.broadcast %cst_52 : f32 to vector<16x128xf32>
    %57 = arith.maximumf %55, %56 : vector<16x128xf32>
    %c0_53 = arith.constant 0 : index
    %c0_54 = arith.constant 0 : index
    %58 = vector.load %arg7[%c0_53, %c0_54] : memref<1x128xf32, #tpu.memory_space<vmem>>, vector<1x128xf32>
    %59 = vector.broadcast %58 : vector<1x128xf32> to vector<16x128xf32>
    %60 = arith.mulf %57, %59 : vector<16x128xf32>
    %c0_55 = arith.constant 0 : index
    %c0_56 = arith.constant 0 : index
    %61 = vector.load %arg8[%c0_55, %c0_56] : memref<1x128xf32, #tpu.memory_space<vmem>>, vector<1x128xf32>
    %62 = vector.broadcast %61 : vector<1x128xf32> to vector<16x128xf32>
    %63 = arith.addf %60, %62 : vector<16x128xf32>
    %64 = arith.addf %63, %4 : vector<16x128xf32>
    %c0_57 = arith.constant 0 : index
    %c0_58 = arith.constant 0 : index
    %c0_59 = arith.constant 0 : index
    %65 = vector.load %arg9[%c0_57, %c0_58, %c0_59] : memref<1x16x128xf32, #tpu.memory_space<vmem>>, vector<1x16x128xf32>
    %66 = vector.shape_cast %65 : vector<1x16x128xf32> to vector<16x128xf32>
    %67 = vector.shape_cast %64 : vector<16x128xf32> to vector<1x16x128xf32>
    tpu.vector_store %arg9[%c0_57, %c0_58, %c0_59], %67 {strides = array<i32>} : memref<1x16x128xf32, #tpu.memory_space<vmem>>, vector<1x16x128xf32>,
    return
  }
  func.func @transform_0(%arg0: i32) -> (i32, i32, i32) {
    %c0_i32 = arith.constant 0 : i32
    %c0_i32_0 = arith.constant 0 : i32
    %c0_i32_1 = arith.constant 0 : i32
    return %arg0, %c0_i32, %c0_i32_0 : i32, i32, i32
  }
  func.func @transform_1(%arg0: i32) -> (i32, i32, i32) {
    %c0_i32 = arith.constant 0 : i32
    %c0_i32_0 = arith.constant 0 : i32
    %c0_i32_1 = arith.constant 0 : i32
    %c0_i32_2 = arith.constant 0 : i32
    return %c0_i32, %c0_i32_0, %c0_i32_1 : i32, i32, i32
  }
  func.func @transform_2(%arg0: i32) -> (i32, i32) {
    %c0_i32 = arith.constant 0 : i32
    %c0_i32_0 = arith.constant 0 : i32
    %c0_i32_1 = arith.constant 0 : i32
    return %c0_i32, %c0_i32_0 : i32, i32
  }
  func.func @transform_3(%arg0: i32) -> (i32, i32) {
    %c0_i32 = arith.constant 0 : i32
    %c0_i32_0 = arith.constant 0 : i32
    %c0_i32_1 = arith.constant 0 : i32
    return %c0_i32, %c0_i32_0 : i32, i32
  }
  func.func @transform_4(%arg0: i32) -> (i32, i32, i32) {
    %c0_i32 = arith.constant 0 : i32
    %c0_i32_0 = arith.constant 0 : i32
    %c0_i32_1 = arith.constant 0 : i32
    %c0_i32_2 = arith.constant 0 : i32
    return %c0_i32, %c0_i32_0, %c0_i32_1 : i32, i32, i32
  }
  func.func @transform_5(%arg0: i32) -> (i32, i32) {
    %c0_i32 = arith.constant 0 : i32
    %c0_i32_0 = arith.constant 0 : i32
    %c0_i32_1 = arith.constant 0 : i32
    return %c0_i32, %c0_i32_0 : i32, i32
  }
  func.func @transform_6(%arg0: i32) -> (i32, i32) {
    %c0_i32 = arith.constant 0 : i32
    %c0_i32_0 = arith.constant 0 : i32
    %c0_i32_1 = arith.constant 0 : i32
    return %c0_i32, %c0_i32_0 : i32, i32
  }
  func.func @transform_7(%arg0: i32) -> (i32, i32) {
    %c0_i32 = arith.constant 0 : i32
    %c0_i32_0 = arith.constant 0 : i32
    %c0_i32_1 = arith.constant 0 : i32
    return %c0_i32, %c0_i32_0 : i32, i32
  }
  func.func @transform_8(%arg0: i32) -> (i32, i32, i32) {
    %c0_i32 = arith.constant 0 : i32
    %c0_i32_0 = arith.constant 0 : i32
    %c0_i32_1 = arith.constant 0 : i32
    return %arg0, %c0_i32, %c0_i32_0 : i32, i32, i32
  }
}

</mosaic_0001>

<bundles_post_ra>
// kernel: tpu_custom_call.1
= control target key start
LH: loop header
LB: loop body
LE: loop exit
PB: predicated region body
PF: predicated region fallthrough
CT: control target
= control target key end

     0   :  { %13 = vsyncpa [#allocation4], 0  ;;  %s2091_s0 = inlined_call_operand.hbm [shape: f32[2,16,128], index: 0, kind: input, shape index: {}]   ;;  %s2092_s1 = inlined_call_operand.hbm [shape: bf16[3,128,128], index: 1, kind: input, shape index: {}]   ;;  %s2093_s2 = inlined_call_operand.vmem [shape: f32[1,128], index: 2, kind: input, shape index: {}]   ;;  %s2094_s3 = inlined_call_operand.vmem [shape: f32[1,128], index: 3, kind: input, shape index: {}]   ;;  %s2095_s4 = inlined_call_operand.hbm [shape: bf16[3,128,128], index: 4, kind: input, shape index: {}]   ;;  %s2096_s5 = inlined_call_operand.vmem [shape: f32[1,128], index: 5, kind: input, shape index: {}]   ;;  %s2097_s6 = inlined_call_operand.vmem [shape: f32[1,128], index: 6, kind: input, shape index: {}]   ;;  %s2098_s7 = inlined_call_operand.vmem [shape: f32[1,128], index: 7, kind: input, shape index: {}]   ;;  %s2099_s8 = inlined_call_operand.hbm [shape: f32[2,16,128], index: 8, kind: output, shape index: {}]  }
   0x1   :  { %15 = vsyncpa [#allocation4 + $0x1], 0 }
   0x2   :  { %16 = vsyncpa [#allocation7], 0 }
   0x3   :  { %17 = vsyncpa [#allocation5], 0 }
   0x4   :  { %19 = vsyncpa [#allocation5 + $0x1], 0  ;;  %s1762_s27 = smov 0   ;;  %s1764_s28 = smov 0  }
   0x5   :  { %s1766_s29 = smov 0   ;;  %s1768_s30 = smov 0  }
   0x6 LB: > { %s1783_s9 = sadd.s32 4294967295, %s1703_s30   ;;  %s1177_s10 = sadd.s32 4294967294, %s1703_s30   ;;  %s1703_s30 = sphi %s1768_s30, %s2119_s30   ;;  %s1699_s29 = sphi %s1766_s29, %s2118_s29   ;;  %s1695_s28 = sphi %s1764_s28, %s2117_s28   ;;  %s1691_s27 = sphi %s1762_s27, %s2116_s27  }
   0x7   : > { %p45_p0 = scmp.ne.s32.totalorder %s1695_s28, %s1691_s27  ;;  %p2100_p1 = scmp.eq.s32.totalorder %s1783_s9, 0 }
   0x8   : > { %p222_p3 = scmp.eq.s32.totalorder %s1177_s10, 1  ;;  %p1178_p5 = scmp.ge.s32.totalorder %s1703_s30, 1 }
   0x9   : > { %p1792_p4 = por %p2100_p1, %p45_p0  ;;  %p229_p7 = scmp.lt.s32.totalorder %s1703_s30, 3 }
   0xa   : > { %p1797_p6 = por %p222_p3, %p45_p0  ;;  %s1705_s14 = smov [#allocation6]  }
   0xb   : > { %s2103_s11 = scalar_select %p1792_p4, 1, 0 }
   0xc   : > { %s2104_s12 = scalar_select %p1797_p6, 1, 0 }
   0xd   : > { %p1802_p8 = pnand %p1178_p5, %p229_p7  ;;  %s241_s15 = sshll.u32 %s1705_s14, 4  ;;  %s1806_s15 = int_to_ptr.vmem [resolvable:$true] %s241_s15 }
   0xe   : > { %s1706_s17 = smov [#allocation8]   ;;  %s1547_s21 = scalar_lea.hbm %s2092_s1, 3072 }
   0xf   : > { %p1436_p9 = pneg %p1802_p8  ;;  %s260_s18 = sshll.u32 %s1706_s17, 4  ;;  %s1817_s18 = int_to_ptr.vmem [resolvable:$true] %s260_s18 }
  0x10   : > { %p1548_p12 = scmp.ne.s32.totalorder %s2092_s1, %s1547_s21  ;;  %p1554_p5 = scmp.lt.u32.totalorder %s1547_s21, %s2092_s1 }
  0x11   : > { %p1813_p11 = pnand %p1436_p9, %p2100_p1 }
  0x13   : > { %p1549_p13 = pneg %p1813_p11 }
  0x15   : > { %p1550_p0 = pnand %p1549_p13, %p1548_p12 }
  0x17   : > { %p1551_p3 = pneg %p1550_p0 }
  0x19   : > { %p1556_p7 = pnand %p1554_p5, %p1551_p3 }
  0x1b   : > { %1559 = shalt.err (!%p1556_p7)
}
  0x1c   : > { %s1560_s26 = scalar_lea.vmem %s1806_s15, 3072  ;;  %p1568_p2 = scmp.lt.s32.totalorder %s1806_s15, %s1806_s15 }
  0x1d   : > { %p1561_p9 = scmp.ne.s32.totalorder %s1806_s15, %s1560_s26  ;;  %p1569_p12 = scmp.lt.s32.totalorder %s1560_s26, %s1560_s26 }
  0x1f   : > { %p1563_p10 = pnand %p1561_p9, %p1549_p13  ;;  %p1570_p0 = por %p1569_p12, %p1568_p2 }
  0x21   : > { %p1564_p1 = pneg %p1563_p10 }
  0x23   : > { %p1571_p6 = pnand %p1570_p0, %p1564_p1 }
  0x25   : > { %1574 = shalt.err (!%p1571_p6)
}
  0x26   : > { %s1707_s10 = smov 64   ;;  %s1708_s14 = smov 4  }
  0x27   : > { %1439 = dma.hbm_to_vmem [thread:$0]  (!%p1813_p11), %s2092_s1, 3072, %s1806_s15, [#allocation7], %s1707_s10, %s1707_s10, %s1708_s14  }
  0x28   : > { %s1575_s22 = scalar_lea.hbm %s2095_s4, 3072 }
  0x29   : > { %p1576_p2 = scmp.ne.s32.totalorder %s2095_s4, %s1575_s22  ;;  %p1582_p10 = scmp.lt.u32.totalorder %s1575_s22, %s2095_s4 }
  0x2b   : > { %p1578_p1 = pnand %p1576_p2, %p1549_p13 }
  0x2d   : > { %p1579_p6 = pneg %p1578_p1 }
  0x2f   : > { %p1584_p3 = pnand %p1582_p10, %p1579_p6 }
  0x31   : > { %1587 = shalt.err (!%p1584_p3)
}
  0x32   : > { %s1588_s15 = scalar_lea.vmem %s1817_s18, 3072  ;;  %p1596_p12 = scmp.lt.s32.totalorder %s1817_s18, %s1817_s18 }
  0x33   : > { %p1589_p5 = scmp.ne.s32.totalorder %s1817_s18, %s1588_s15  ;;  %p1597_p0 = scmp.lt.s32.totalorder %s1588_s15, %s1588_s15 }
  0x35   : > { %p1591_p7 = pnand %p1589_p5, %p1549_p13  ;;  %p1598_p2 = por %p1597_p0, %p1596_p12 }
  0x37   : > { %p1592_p9 = pneg %p1591_p7 }
  0x39   : > { %p1599_p1 = pnand %p1598_p2, %p1592_p9 }
  0x3b   : > { %1602 = shalt.err (!%p1599_p1)
}
  0x3c   : > { %1442 = dma.hbm_to_vmem [thread:$0]  (!%p1813_p11), %s2095_s4, 3072, %s1817_s18, [#allocation7], %s1707_s10, %s1707_s10, %s1708_s14  }
  0x3d   : > { %s1872_s20 = sadd.s32 1, %s1703_s30   ;;  %s32_s16 = sadd.s32 1, %s1699_s29 }
  0x3e   : > { %s29_s21 = ssub.s32 %s1703_s30, %s1872_s20  ;;  %p39_p13 = scmp.ne.s32.totalorder %s1699_s29, %s1695_s28 }
  0x3f   : > { %p30_p6 = scmp.eq.s32.totalorder %s29_s21, 0  ;;  %p40_p10 = scmp.eq.s32.totalorder %s1703_s30, 0 }
  0x40   : > { %p2107_p3 = scmp.eq.s32.totalorder %s1783_s9, 1  ;;  %p1453_p7 = scmp.lt.s32.totalorder %s1703_s30, 2 }
  0x41   : > { %s1888_s23 = scalar_select %p30_p6, %s1699_s29, %s32_s16  }
  0x42   : > { %p1882_p5 = por %p2107_p3, %p39_p13  ;;  %p41_p9 = por %p40_p10, %p39_p13 }
  0x43   : > { %s283_s24 = sand.u32 1, %s1699_s29   ;;  %s1248_s18 = sshll.u32 %s1703_s30, 8 }
  0x44   : > { %s2108_s22 = scalar_select %p1882_p5, 1, 0 }
  0x45   : > { %s1182_s25 = sshll.u32 %s283_s24, 4  ;;  %s1895_s26 = scalar_lea.hbm %s2091_s0, %s1248_s18 }
  0x46   : > { %s287_s15 = scalar_lea.vmem [#allocation3], %s1182_s25  ;;  %p1899_p11 = pnand %p1453_p7, %p41_p9 }
  0x47   : > { %s294_s17 = sshll.u32 %s287_s15, 4  ;;  %s1903_s16 = scalar_lea.sflag [#allocation4], %s283_s24  ;;  %s1897_s17 = int_to_ptr.vmem [resolvable:$true] %s294_s17 }
  0x48   : > { %s1603_s21 = scalar_lea.hbm %s1895_s26, 256  ;;  %p1605_p0 = pneg %p1899_p11 }
  0x49   : > { %p1604_p12 = scmp.ne.s32.totalorder %s1895_s26, %s1603_s21  ;;  %s1608_s10 = scalar_lea.hbm %s2091_s0, 512 }
  0x4a   : > { %p1609_p13 = scmp.lt.u32.totalorder %s1895_s26, %s2091_s0  ;;  %p1610_p6 = scmp.lt.u32.totalorder %s1608_s10, %s1603_s21 }
  0x4b   : > { %p1606_p2 = pnand %p1605_p0, %p1604_p12  ;;  %p1612_p3 = scmp.lt.u32.totalorder %s1603_s21, %s1895_s26 }
  0x4c   : > { %p1611_p10 = por %p1610_p6, %p1609_p13 }
  0x4d   : > { %p1607_p1 = pneg %p1606_p2 }
  0x4e   : > { %p1613_p7 = por %p1612_p3, %p1611_p10 }
  0x50   : > { %p1614_p9 = pnand %p1613_p7, %p1607_p1 }
  0x52   : > { %1617 = shalt.err (!%p1614_p9)
}
  0x53   : > { %s1618_s24 = scalar_lea.vmem %s1897_s17, 256  ;;  %s1709_s25 = smov [#allocation3]  }
  0x54   : > { %p1619_p12 = scmp.ne.s32.totalorder %s1897_s17, %s1618_s24  ;;  %s1623_s18 = sshll.u32 %s1709_s25, 4  ;;  %s1624_s18 = int_to_ptr.vmem [resolvable:$false] %s1623_s18 }
  0x55   : > { %s1625_s14 = scalar_lea.vmem %s1624_s18, 512  ;;  %p1626_p4 = scmp.lt.s32.totalorder %s1897_s17, %s1624_s18 }
  0x56   : > { %p1621_p2 = pnand %p1619_p12, %p1605_p0  ;;  %p1627_p13 = scmp.lt.s32.totalorder %s1625_s14, %s1618_s24 }
  0x58   : > { %p1622_p5 = pneg %p1621_p2  ;;  %p1628_p6 = por %p1627_p13, %p1626_p4 }
  0x5a   : > { %p1629_p10 = pnand %p1628_p6, %p1622_p5 }
  0x5c   : > { %1632 = shalt.err (!%p1629_p10)
}
  0x5d   : > { %s1710_s21 = smov 128   ;;  %s1711_s10 = smov 8  }
  0x5e   : > { %1446 = dma.hbm_to_vmem [thread:$0]  (!%p1899_p11), %s1895_s26, 256, %s1897_s17, %s1903_s16, %s1710_s21, %s1710_s21, %s1711_s10  }
  0x5f   : > { %306 = sbr.rel (%p1802_p8) target bundleno = 669 (0x29d), region = 52  ;;  %s1934_s15 = sand.u32 (!%p1802_p8), 1, %s1695_s28  }
  0x60   : > { %s1186_s24 = sshll.u32 (!%p1802_p8), %s1934_s15, 4  ;;  %s309_s25 = scalar_lea.sflag (!%p1802_p8), [#allocation4], %s1934_s15 }
  0x61   : > { %s1940_s18 = scalar_lea.vmem (!%p1802_p8), [#allocation3], %s1186_s24  ;;  %p2110_p4 = scmp.ne.s32.totalorder (!%p1802_p8), %s2103_s11, 0 }
  0x66   : > { %1678 = dma.done.wait (%p2110_p4), %s309_s25, 256  }
  0x67   : > { %1680 = vsyncadd (%p2110_p4), %s309_s25, 4294967040  ;;  %p2111_p5 = scmp.eq.s32.totalorder %s1783_s9, 0 }
  0x69   : > { %1682 = dma.done.wait (%p2111_p5), [#allocation7], 6144   ;;  %p2112_p8 = pmov %p2111_p5 }
  0x6a   : > { %v1712_v0 = vmov 0.0   ;;  %vm1713_vm0 = vmmov 0   ;;  %v1499_v1 = vld [vmem:[#allocation6 + $0x40] sm:$0xff]   ;;  %v1501_v3 = vld [vmem:[#allocation6 + $0x48] sm:$0xff]   ;;  %v1503_v5 = vld [vmem:[#allocation6 + $0x50] sm:$0xff]   ;;  %s352_s11 = scalar_lea.vmem [#allocation9], %s1186_s24 }
  0x6b   : > { %1684 = vsyncadd (%p2112_p8), [#allocation7], 4294961152  ;;  %1304 = vmatprep.subr.bf16.mxu0 %v1712_v0  ;;  %354 = vst [vmem:[#allocation2] sm:$0x1] %v1712_v0  ;;  %1324 = vmatprep.subr.bf16.mxu1 %v1712_v0  ;;  %v1500_v2 = vld [vmem:[#allocation6] sm:$0xff]   ;;  %v1502_v4 = vld [vmem:[#allocation6 + $0x8] sm:$0xff]  }
  0x6c   : > { %355 = vst [vmem:[#allocation2 + $0x11] sm:$0x1] %v1712_v0  ;;  %1320 = vmatprep.mubr.msk.bf16.mxu0 %vm1713_vm0, %v1712_v0  ;;  %1340 = vmatprep.mubr.msk.bf16.mxu1 %vm1713_vm0, %v1712_v0  ;;  %v1504_v6 = vld [vmem:[#allocation6 + $0x10] sm:$0xff]   ;;  %v1505_v7 = vld [vmem:[#allocation6 + $0x58] sm:$0xff]   ;;  %v1507_v9 = vld [vmem:[#allocation6 + $0x60] sm:$0xff]   ;;  %s1085_s13 = sshll.u32 %s352_s11, 4  ;;  %s2046_s13 = int_to_ptr.vmem [resolvable:$true] %s1085_s13 }
  0x6d   : > { %1305 = vmatpush3.bf16.msra.mxu0 %v1499_v1  ;;  %1325 = vmatpush3.bf16.msra.mxu1 %v1500_v2  ;;  %v1506_v8 = vld [vmem:[#allocation6 + $0x18] sm:$0xff]   ;;  %v1508_v10 = vld [vmem:[#allocation6 + $0x20] sm:$0xff]   ;;  %v1509_v13 = vld [vmem:[#allocation6 + $0x68] sm:$0xff]   ;;  %s1633_s24 = scalar_lea.vmem %s2046_s13, 256  ;;  %p2113_p0 = scmp.ne.s32.totalorder %s2108_s22, 0 }
  0x6e   : > { %1306 = vmatprep.subr.bf16.mxu0 %v1712_v0  ;;  %1326 = vmatprep.subr.bf16.mxu1 %v1712_v0  ;;  %v1967_v11 = vld [vmem:[%s1940_s18] sm:$0xff]  ;;  %v1970_v12 = vld [vmem:[%s1940_s18 + $0x8] sm:$0xff]  ;;  %s1249_s18 = sshll.u32 %s1783_s9, 8  ;;  %s1072_s9 = scalar_lea.sflag [#allocation5], %s1934_s15 }
  0x6f   : > { %358 = vst [vmem:[#allocation2 + $0x1] sm:$0xff] %v1967_v11  ;;  %359 = vst [vmem:[#allocation2 + $0x9] sm:$0xff] %v1970_v12  ;;  %v1510_v14 = vld [vmem:[#allocation6 + $0x28] sm:$0xff]   ;;  %v1511_v15 = vld [vmem:[#allocation6 + $0x70] sm:$0xff]   ;;  %v381_v22 = vpack.c.bf16 %v1970_v12, %v1967_v11  ;;  %s2044_s19 = scalar_lea.hbm %s2099_s8, %s1249_s18  ;;  %p1634_p11 = scmp.ne.s32.totalorder %s2046_s13, %s1633_s24 }
  0x70   : > { %v1512_v16 = vld [vmem:[#allocation6 + $0x30] sm:$0xff]   ;;  %v1513_v17 = vld [vmem:[#allocation6 + $0x78] sm:$0xff]   ;;  %v1515_v21 = vld [vmem:[#allocation6 + $0x80] sm:$0xff]   ;;  %s1714_s16 = smov [#allocation9]  }
  0x71   : > { %1307 = vmatpush3.bf16.msra.mxu0 %v1501_v3  ;;  %1327 = vmatpush3.bf16.msra.mxu1 %v1502_v4  ;;  %v1514_v18 = vld [vmem:[#allocation6 + $0x38] sm:$0xff]   ;;  %v1516_v24 = vld [vmem:[#allocation6 + $0x88] sm:$0xff]   ;;  %v1517_v25 = vld [vmem:[#allocation6 + $0x90] sm:$0xff]   ;;  %p1635_p1 = pnand %p1634_p11, %p2113_p0  ;;  %s1637_s14 = sshll.u32 %s1714_s16, 4  ;;  %s1638_s14 = int_to_ptr.vmem [resolvable:$false] %s1637_s14 }
  0x72   : > { %1308 = vmatprep.subr.bf16.mxu0 %v1712_v0  ;;  %1328 = vmatprep.subr.bf16.mxu1 %v1712_v0  ;;  %v1518_v26 = vld [vmem:[#allocation6 + $0x98] sm:$0xff]   ;;  %v1519_v27 = vld [vmem:[#allocation6 + $0xa0] sm:$0xff]   ;;  %v1520_v28 = vld [vmem:[#allocation6 + $0xa8] sm:$0xff]   ;;  %s1639_s21 = scalar_lea.vmem %s1638_s14, 512  ;;  %p1640_p7 = scmp.lt.s32.totalorder %s2046_s13, %s1638_s14 }
  0x73   : > { %v1521_v29 = vld [vmem:[#allocation6 + $0xb0] sm:$0xff]   ;;  %v1522_v30 = vld [vmem:[#allocation6 + $0xb8] sm:$0xff]   ;;  %v1523_v34 = vld [vmem:[#allocation8 + $0x40] sm:$0xff]   ;;  %p1636_p3 = pneg %p1635_p1  ;;  %p1641_p9 = scmp.lt.s32.totalorder %s1639_s21, %s1633_s24 }
  0x74   : > { %v1524_v35 = vld [vmem:[#allocation8] sm:$0xff]   ;;  %v1525_v36 = vld [vmem:[#allocation8 + $0x48] sm:$0xff]   ;;  %v1527_v38 = vld [vmem:[#allocation8 + $0x50] sm:$0xff]  }
  0x75   : > { %1309 = vmatpush3.bf16.msra.mxu0 %v1503_v5  ;;  %1329 = vmatpush3.bf16.msra.mxu1 %v1504_v6  ;;  %v1526_v37 = vld [vmem:[#allocation8 + $0x8] sm:$0xff]   ;;  %v1528_v39 = vld [vmem:[#allocation8 + $0x10] sm:$0xff]   ;;  %v1529_v40 = vld [vmem:[#allocation8 + $0x58] sm:$0xff]   ;;  %p1642_p12 = por %p1641_p9, %p1640_p7 }
  0x76   : > { %1310 = vmatprep.subr.bf16.mxu0 %v1712_v0  ;;  %1330 = vmatprep.subr.bf16.mxu1 %v1712_v0  ;;  %v360_v19 = vld [vmem:[#allocation2] sm:$0xff]  ;;  %v361_v20 = vld [vmem:[#allocation2 + $0x8] sm:$0xff]  ;;  %v1531_v41 = vld [vmem:[#allocation8 + $0x60] sm:$0xff]  }
  0x77   : > { %v362_v23 = vpack.c.bf16 %v361_v20, %v360_v19  ;;  %v577_v31 = vld [vmem:[#allocation2 + $0x2] sm:$0xff]  ;;  %v578_v32 = vld [vmem:[#allocation2 + $0xa] sm:$0xff]  ;;  %v1532_v45 = vld [vmem:[#allocation8 + $0x20] sm:$0xff]   ;;  %p1643_p2 = pnand %p1642_p12, %p1636_p3 }
  0x78   : > { %v579_v33 = vpack.c.bf16 %v578_v32, %v577_v31  ;;  %v1533_v42 = vld [vmem:[#allocation8 + $0x68] sm:$0xff]   ;;  %v1530_v43 = vld [vmem:[#allocation8 + $0x18] sm:$0xff]   ;;  %v1535_v44 = vld [vmem:[#allocation8 + $0x70] sm:$0xff]  }
  0x79   : > { %1311 = vmatpush3.bf16.msra.mxu0 %v1505_v7  ;;  %1331 = vmatpush3.bf16.msra.mxu1 %v1506_v8  ;;  %v1537_v46 = vld [vmem:[#allocation8 + $0x78] sm:$0xff]   ;;  %v1534_v47 = vld [vmem:[#allocation8 + $0x28] sm:$0xff]   ;;  %v1536_v48 = vld [vmem:[#allocation8 + $0x30] sm:$0xff]  }
  0x7a   : > { %1312 = vmatprep.subr.bf16.mxu0 %v1712_v0  ;;  %1332 = vmatprep.subr.bf16.mxu1 %v1712_v0  ;;  %v1538_v49 = vld [vmem:[#allocation8 + $0x38] sm:$0xff]   ;;  %v1214_v61 = vld [vmem:[%s2093_s2] ss:$0 sm:$0xff] }
  0x7b   : > { %v1215_v5 = vld [vmem:[%s2094_s3] ss:$0 sm:$0xff]  ;;  %v1542_v20 = vld [vmem:[#allocation8 + $0x98] sm:$0xff]  }
  0x7d   : > { %1313 = vmatpush3.bf16.msra.mxu0 %v1507_v9  ;;  %1333 = vmatpush3.bf16.msra.mxu1 %v1508_v10 }
  0x7e   : > { %1314 = vmatprep.subr.bf16.mxu0 %v1712_v0  ;;  %1334 = vmatprep.subr.bf16.mxu1 %v1712_v0 }
  0x81   : > { %1315 = vmatpush3.bf16.msra.mxu0 %v1509_v13  ;;  %1335 = vmatpush3.bf16.msra.mxu1 %v1510_v14  ;;  %v1539_v13 = vld [vmem:[#allocation8 + $0x80] sm:$0xff]  }
  0x82   : > { %1316 = vmatprep.subr.bf16.mxu0 %v1712_v0  ;;  %1336 = vmatprep.subr.bf16.mxu1 %v1712_v0 }
  0x85   : > { %1317 = vmatpush3.bf16.msra.mxu0 %v1511_v15  ;;  %1337 = vmatpush3.bf16.msra.mxu1 %v1512_v16  ;;  %v1540_v15 = vld [vmem:[#allocation8 + $0x88] sm:$0xff]  }
  0x86   : > { %1318 = vmatprep.subr.bf16.mxu0 %v1712_v0  ;;  %1338 = vmatprep.subr.bf16.mxu1 %v1712_v0 }
  0x89   : > { %1319 = vmatpush3.bf16.msra.mxu0 %v1513_v17  ;;  %1339 = vmatpush3.bf16.msra.mxu1 %v1514_v18  ;;  %v1541_v18 = vld [vmem:[#allocation8 + $0x90] sm:$0xff]  }
  0x8a   : > { %1344 = vmatprep.subr.bf16.mxu0 %v1712_v0  ;;  %1364 = vmatprep.subr.bf16.mxu1 %v1712_v0 }
  0x8c   : > { %1321 = vmatmul.mubr.bf16.vlgmr.msra.gmra.mrb[0].mxu0 %v381_v22  ;;  %1341 = vmatmul.mubr.bf16.vlgmr.msra.gmra.mrb[0].mxu1 %v362_v23  ;;  %v1544_v22 = vld [vmem:[#allocation8 + $0xa8] sm:$0xff]   ;;  %v1545_v23 = vld [vmem:[#allocation8 + $0xb0] sm:$0xff]  }
  0x8d   : > { %1345 = vmatpush3.bf16.msra.mxu0 %v1515_v21  ;;  %1360 = vmatprep.mubr.msk.bf16.mxu0 %vm1713_vm0, %v1712_v0  ;;  %v1543_v21 = vld [vmem:[#allocation8 + $0xa0] sm:$0xff]  }
  0x8e   : > { %1346 = vmatprep.subr.bf16.mxu0 %v1712_v0  ;;  %1380 = vmatprep.mubr.msk.bf16.mxu1 %vm1713_vm0, %v1712_v0 }
  0x8f   : > { %1365 = vmatpush3.bf16.msra.mxu1 %v1523_v34 }
  0x90   : > { %1366 = vmatprep.subr.bf16.mxu1 %v1712_v0 }
  0x91   : > { %1347 = vmatpush3.bf16.msra.mxu0 %v1516_v24  ;;  %v1546_v24 = vld [vmem:[#allocation8 + $0xb8] sm:$0xff]  }
  0x92   : > { %1348 = vmatprep.subr.bf16.mxu0 %v1712_v0 }
  0x93   : > { %1367 = vmatpush3.bf16.msra.mxu1 %v1525_v36 }
  0x94   : > { %1368 = vmatprep.subr.bf16.mxu1 %v1712_v0 }
  0x95   : > { %1349 = vmatpush3.bf16.msra.mxu0 %v1517_v25 }
  0x96   : > { %1350 = vmatprep.subr.bf16.mxu0 %v1712_v0 }
  0x97   : > { %1369 = vmatpush3.bf16.msra.mxu1 %v1527_v38 }
  0x98   : > { %1370 = vmatprep.subr.bf16.mxu1 %v1712_v0 }
  0x99   : > { %1351 = vmatpush3.bf16.msra.mxu0 %v1518_v26 }
  0x9a   : > { %1352 = vmatprep.subr.bf16.mxu0 %v1712_v0 }
  0x9b   : > { %1371 = vmatpush3.bf16.msra.mxu1 %v1529_v40 }
  0x9c   : > { %1372 = vmatprep.subr.bf16.mxu1 %v1712_v0 }
  0x9d   : > { %1353 = vmatpush3.bf16.msra.mxu0 %v1519_v27 }
  0x9e   : > { %1354 = vmatprep.subr.bf16.mxu0 %v1712_v0 }
  0x9f   : > { %1373 = vmatpush3.bf16.msra.mxu1 %v1531_v41 }
  0xa0   : > { %1374 = vmatprep.subr.bf16.mxu1 %v1712_v0 }
  0xa1   : > { %1355 = vmatpush3.bf16.msra.mxu0 %v1520_v28 }
  0xa2   : > { %1356 = vmatprep.subr.bf16.mxu0 %v1712_v0 }
  0xa3   : > { %1375 = vmatpush3.bf16.msra.mxu1 %v1533_v42 }
  0xa4   : > { %1376 = vmatprep.subr.bf16.mxu1 %v1712_v0 }
  0xa5   : > { %1357 = vmatpush3.bf16.msra.mxu0 %v1521_v29 }
  0xa6   : > { %1358 = vmatprep.subr.bf16.mxu0 %v1712_v0 }
  0xa7   : > { %1377 = vmatpush3.bf16.msra.mxu1 %v1535_v44 }
  0xa8   : > { %1378 = vmatprep.subr.bf16.mxu1 %v1712_v0 }
  0xa9   : > { %1359 = vmatpush3.bf16.msra.mxu0 %v1522_v30 }
  0xaa   : > { %1384 = vmatprep.subr.bf16.mxu0 %v1712_v0 }
  0xab   : > { %1379 = vmatpush3.bf16.msra.mxu1 %v1537_v46 }
  0xac   : > { %1361 = vmatmul.mubr.bf16.vlgmr.msra.gmra.mrb[4].mxu0 %v579_v33  ;;  %1404 = vmatprep.subr.bf16.mxu1 %v1712_v0 }
  0xad   : > { %1400 = vmatprep.mubr.msk.bf16.mxu0 %vm1713_vm0, %v1712_v0  ;;  %1385 = vmatpush3.bf16.msra.mxu0 %v1524_v35 }
  0xae   : > { %1386 = vmatprep.subr.bf16.mxu0 %v1712_v0 }
  0xb1   : > { %1387 = vmatpush3.bf16.msra.mxu0 %v1526_v37 }
  0xb2   : > { %1388 = vmatprep.subr.bf16.mxu0 %v1712_v0 }
  0xb5   : > { %1389 = vmatpush3.bf16.msra.mxu0 %v1528_v39 }
  0xb6   : > { %1390 = vmatprep.subr.bf16.mxu0 %v1712_v0 }
  0xb9   : > { %1391 = vmatpush3.bf16.msra.mxu0 %v1530_v43 }
  0xba   : > { %1392 = vmatprep.subr.bf16.mxu0 %v1712_v0 }
  0xbd   : > { %1393 = vmatpush3.bf16.msra.mxu0 %v1532_v45  ;;  %v1241_v45 = vld [vmem:[%s2097_s6] ss:$0 sm:$0xff] }
  0xbe   : > { %1394 = vmatprep.subr.bf16.mxu0 %v1712_v0 }
  0xc1   : > { %1395 = vmatpush3.bf16.msra.mxu0 %v1534_v47 }
  0xc2   : > { %1396 = vmatprep.subr.bf16.mxu0 %v1712_v0 }
  0xc5   : > { %1397 = vmatpush3.bf16.msra.mxu0 %v1536_v48  ;;  %v1242_v48 = vld [vmem:[%s2098_s7] ss:$0 sm:$0xff] }
  0xc6   : > { %1398 = vmatprep.subr.bf16.mxu0 %v1712_v0 }
  0xc9   : > { %1399 = vmatpush3.bf16.msra.mxu0 %v1538_v49 }
 0x15f   : > { %v481_v50 = vpop.f32.mrb[0].mxu0  ;;  %v570_v51 = vpop.f32.mrb[0].mxu1 }
 0x160   : > { %v1322_v52 = vpop.f32.mrb[1].mxu0  ;;  %v571_v53 = vadd.f32 %v570_v51, %v481_v50  ;;  %v1342_v54 = vpop.f32.mrb[1].mxu1 }
 0x161   : > { %v484_v55 = vpop.f32.mrb[2].mxu0  ;;  %v573_v56 = vpop.f32.mrb[2].mxu1 }
 0x162   : > { %v1323_v57 = vpop.f32.mrb[3].mxu0  ;;  %v574_v58 = vadd.f32 %v573_v56, %v484_v55  ;;  %v1343_v59 = vpop.f32.mrb[3].mxu1 }
 0x17f   : > { %v679_v60 = vpop.f32.mrb[4].mxu0 }
 0x180   : > { %v686_v62 = vadd.f32 %v679_v60, %v571_v53  ;;  %v1362_v63 = vpop.f32.mrb[5].mxu0 }
 0x181   : > { %v682_v1 = vpop.f32.mrb[6].mxu0 }
 0x182   : > { %v695_v2 = vadd.f32 %v1214_v61, %v686_v62  ;;  %v687_v3 = vadd.f32 %v682_v1, %v574_v58  ;;  %v1363_v4 = vpop.f32.mrb[7].mxu0 }
 0x184   : > { %v697_v6 = vmax.f32 %v695_v2, 0.0  ;;  %v696_v7 = vadd.f32 %v1214_v61, %v687_v3 }
 0x186   : > { %v706_v8 = vadd.f32 %v1215_v5, %v697_v6  ;;  %v698_v9 = vmax.f32 %v696_v7, 0.0 }
 0x188   : > { %708 = vst [vmem:[#allocation2 + $0x1] sm:$0xff] %v706_v8  ;;  %v707_v10 = vadd.f32 %v1215_v5, %v698_v9 }
 0x18a   : > { %709 = vst [vmem:[#allocation2 + $0x9] sm:$0xff] %v707_v10  ;;  %v731_v14 = vpack.c.bf16 %v707_v10, %v706_v8 }
 0x18c   : > { %1381 = vmatmul.mubr.bf16.vlgmr.msra.gmra.mrb[4].mxu1 %v731_v14 }
 0x18d   : > { %1405 = vmatpush3.bf16.msra.mxu1 %v1539_v13  ;;  %1420 = vmatprep.mubr.msk.bf16.mxu1 %vm1713_vm0, %v1712_v0 }
 0x18e   : > { %1406 = vmatprep.subr.bf16.mxu1 %v1712_v0 }
 0x18f   : > { %v710_v16 = vld [vmem:[#allocation2] sm:$0xff] }
 0x191   : > { %v711_v17 = vld [vmem:[#allocation2 + $0x8] sm:$0xff]  ;;  %1407 = vmatpush3.bf16.msra.mxu1 %v1540_v15 }
 0x192   : > { %v712_v19 = vpack.c.bf16 %v711_v17, %v710_v16  ;;  %1408 = vmatprep.subr.bf16.mxu1 %v1712_v0  ;;  %v927_v25 = vld [vmem:[#allocation2 + $0x2] sm:$0xff]  ;;  %v928_v26 = vld [vmem:[#allocation2 + $0xa] sm:$0xff] }
 0x193   : > { %v929_v27 = vpack.c.bf16 %v928_v26, %v927_v25 }
 0x194   : > { %1401 = vmatmul.mubr.bf16.vlgmr.msra.gmra.mrb[8].mxu0 %v712_v19 }
 0x195   : > { %1409 = vmatpush3.bf16.msra.mxu1 %v1541_v18 }
 0x196   : > { %1410 = vmatprep.subr.bf16.mxu1 %v1712_v0 }
 0x199   : > { %1411 = vmatpush3.bf16.msra.mxu1 %v1542_v20 }
 0x19a   : > { %1412 = vmatprep.subr.bf16.mxu1 %v1712_v0 }
 0x19d   : > { %1413 = vmatpush3.bf16.msra.mxu1 %v1543_v21 }
 0x19e   : > { %1414 = vmatprep.subr.bf16.mxu1 %v1712_v0 }
 0x1a1   : > { %1415 = vmatpush3.bf16.msra.mxu1 %v1544_v22 }
 0x1a2   : > { %1416 = vmatprep.subr.bf16.mxu1 %v1712_v0 }
 0x1a5   : > { %1417 = vmatpush3.bf16.msra.mxu1 %v1545_v23 }
 0x1a6   : > { %1418 = vmatprep.subr.bf16.mxu1 %v1712_v0  ;;  %v1240_v0 = vld [vmem:[%s2096_s5] ss:$0 sm:$0xff] }
 0x1a9   : > { %1419 = vmatpush3.bf16.msra.mxu1 %v1546_v24 }
 0x1ac   : > { %1421 = vmatmul.mubr.bf16.vlgmr.msra.gmra.mrb[8].mxu1 %v929_v27 }
 0x25f   : > { %v831_v28 = vpop.f32.mrb[4].mxu1 }
 0x260   : > { %v1382_v29 = vpop.f32.mrb[5].mxu1 }
 0x261   : > { %v834_v30 = vpop.f32.mrb[6].mxu1 }
 0x262   : > { %v1383_v31 = vpop.f32.mrb[7].mxu1 }
 0x267   : > { %v920_v32 = vpop.f32.mrb[8].mxu0 }
 0x268   : > { %v921_v33 = vadd.f32 %v920_v32, %v831_v28  ;;  %v1402_v34 = vpop.f32.mrb[9].mxu0 }
 0x269   : > { %v923_v35 = vpop.f32.mrb[10].mxu0 }
 0x26a   : > { %v924_v36 = vadd.f32 %v923_v35, %v834_v30  ;;  %v1403_v37 = vpop.f32.mrb[11].mxu0 }
 0x27f   : > { %v1029_v38 = vpop.f32.mrb[8].mxu1 }
 0x280   : > { %v1036_v39 = vadd.f32 %v1029_v38, %v921_v33  ;;  %v1422_v40 = vpop.f32.mrb[9].mxu1 }
 0x281   : > { %v1032_v41 = vpop.f32.mrb[10].mxu1 }
 0x282   : > { %v1045_v42 = vadd.f32 %v1240_v0, %v1036_v39  ;;  %v1037_v43 = vadd.f32 %v1032_v41, %v924_v36  ;;  %v1423_v44 = vpop.f32.mrb[11].mxu1 }
 0x284   : > { %v1047_v46 = vmax.f32 %v1045_v42, 0.0  ;;  %v1046_v47 = vadd.f32 %v1240_v0, %v1037_v43 }
 0x286   : > { %v1056_v49 = vmul.f32 %v1241_v45, %v1047_v46  ;;  %v1048_v50 = vmax.f32 %v1046_v47, 0.0 }
 0x288   : > { %v1065_v51 = vadd.f32 %v1242_v48, %v1056_v49  ;;  %v1057_v52 = vmul.f32 %v1241_v45, %v1048_v50 }
 0x28a   : > { %v1067_v53 = vadd.f32 %v1065_v51, %v1967_v11  ;;  %v1066_v54 = vadd.f32 %v1242_v48, %v1057_v52 }
 0x28c   : > { %1069 = vst [vmem:[%s352_s11] sm:$0xff] %v1067_v53  ;;  %v1068_v55 = vadd.f32 %v1066_v54, %v1970_v12 }
 0x28e   : > { %1070 = vst [vmem:[%s352_s11 + $0x8] sm:$0xff] %v1068_v55 }
 0x28f   : > { %1646 = shalt.err (!%p1643_p2)
}
 0x290   : > { %s1647_s10 = scalar_lea.hbm %s2044_s19, 256  ;;  %s1651_s11 = scalar_lea.hbm %s2099_s8, 512 }
 0x291   : > { %p1648_p13 = scmp.ne.s32.totalorder %s2044_s19, %s1647_s10  ;;  %p1652_p4 = scmp.lt.u32.totalorder %s2044_s19, %s2099_s8 }
 0x292   : > { %p1653_p5 = scmp.lt.u32.totalorder %s1651_s11, %s1647_s10  ;;  %p1655_p11 = scmp.lt.u32.totalorder %s1647_s10, %s2044_s19 }
 0x293   : > { %p1649_p6 = pnand %p1648_p13, %p2113_p0 }
 0x294   : > { %p1654_p8 = por %p1653_p5, %p1652_p4 }
 0x295   : > { %p1650_p10 = pneg %p1649_p6 }
 0x296   : > { %p1656_p1 = por %p1655_p11, %p1654_p8 }
 0x298   : > { %p1657_p3 = pnand %p1656_p1, %p1650_p10 }
 0x29a   : > { %1660 = shalt.err (!%p1657_p3)
}
 0x29b   : > { %s1715_s24 = smov 128   ;;  %s1716_s16 = smov 8  }
 0x29c   : > { %1434 = dma.vmem_to_hbm [thread:$0]  (%p2113_p0), %s2046_s13, 256, %s2044_s19, %s1072_s9, %s1715_s24, %s1715_s24, %s1716_s16  }
 0x29d PF: > { %s1100_s14 = sand.u32 1, %s1691_s27   ;;  %p2114_p7 = scmp.ne.s32.totalorder %s2104_s12, 0 }
 0x29e   : > { %p2115_p9 = scmp.ge.s32.totalorder %s1703_s30, 2  ;;  %s1101_s21 = scalar_lea.sflag [#allocation5], %s1100_s14 }
 0x2a0   : > { %p1448_p12 = pnand %p2115_p9, %p2114_p7 }
 0x2a2   : > { %1686 = dma.done.wait (!%p1448_p12), %s1101_s21, 256  }
 0x2a3   : > { %1688 = vsyncadd (!%p1448_p12), %s1101_s21, 4294967040  ;;  %p22_p2 = scmp.ge.s32.totalorder %s1872_s20, 4   ;;  %s2116_s27 = smov %s1695_s28 }
 0x2a4   : > { %s2117_s28 = smov %s1699_s29  ;;  %s2118_s29 = smov %s1888_s23 }
 0x2a5   : > { %s2119_s30 = smov %s1872_s20  ;;  %24 = sbr.rel (!%p22_p2) target bundleno = 6 (0x6), region = 109 }
 0x2ac   :  { %1106 = vsyncpa [#allocation4], 1 }
 0x2ad   :  { %1108 = vsyncpa [#allocation4 + $0x1], 1 }
 0x2ae   :  { %1109 = vsyncpa [#allocation7], 1 }
 0x2af   :  { %1110 = vsyncpa [#allocation5], 1 }
 0x2b0   :  { %1112 = vsyncpa [#allocation5 + $0x1], 1 }

</bundles_post_ra>
